<compile_context>
chip_gen: v7x
topology: tpu7x:2x2x1
jax: 0.10.0
libtpu: 0.0.40
codegen_flags: <defaults>
</compile_context>

<pallas_src>
import jax
import jax.numpy as jnp
from jax.experimental import pallas as pl
from jax.experimental.pallas import tpu as pltpu

_BN_EPS = 1e-3
_VMEM_BLOCK_BUDGET = 12 * 1024 * 1024   # target double-buffered block bytes
_VMEM_LIMIT_BYTES = 48 * 1024 * 1024    # scoped VMEM request (v7x headroom)


def _conv_pool_stats_kernel(patches_ref,   # (1, 9*Cin, T)  im2col taps, tap-major
                            w_ref,         # (Cconv, 9*Cin) fused conv weight
                            y_ref,         # (1, Cout, T)   pre-BN activations
                            sum_ref,       # (1, Cout, 1)   per-image accumulator
                            sq_ref):       # (1, Cout, 1)   per-image accumulator
    t = pl.program_id(1)
    cin = patches_ref.shape[1] // 9
    patches = patches_ref[0]                                   # (9*Cin, T)

    # ---- conv 3x3 / stride 2 / pad 1: one fused MXU matmul, K = 9*Cin ------
    # (bias dropped: a per-channel constant cancels under batch-norm)
    conv = jnp.dot(w_ref[...], patches, preferred_element_type=jnp.float32)

    # ---- maxpool 2x2 / stride 2: pool taps == conv taps k in {4,5,7,8} -----
    pooled = jnp.maximum(
        jnp.maximum(patches[4 * cin:5 * cin, :], patches[5 * cin:6 * cin, :]),
        jnp.maximum(patches[7 * cin:8 * cin, :], patches[8 * cin:9 * cin, :]))

    # ---- channel concat built in registers -> one full-height store --------
    tile = jnp.concatenate([conv, pooled], axis=0)              # (Cout, T)
    y_ref[0] = tile

    # ---- per-channel sum / sumsq accumulated across pixel tiles ------------
    @pl.when(t == 0)
    def _():
        sum_ref[...] = jnp.zeros_like(sum_ref)
        sq_ref[...] = jnp.zeros_like(sq_ref)

    sum_ref[0] += jnp.sum(tile, axis=1, keepdims=True)
    sq_ref[0] += jnp.sum(tile * tile, axis=1, keepdims=True)


def _bn_relu_kernel(y_ref,        # (1, Cout, T)
                    scale_ref,    # (Cout, 1)
                    shift_ref,    # (Cout, 1)
                    out_ref):     # (1, Cout, T)
    out_ref[...] = jnp.maximum(
        y_ref[...] * scale_ref[...] + shift_ref[...], 0.0)


def _pick_tile_hw(hw, bytes_per_col, budget_bytes=_VMEM_BLOCK_BUDGET):
    """Largest power-of-two multiple of 128 dividing hw whose double-buffered
    block working set stays under budget_bytes; falls back to full rows."""
    if hw % 128 != 0:
        # TODO(synk): pad HW up to a multiple of 128 and mask the padded
        # lanes out of the BN statistics instead of taking full rows.
        return hw
    t = 128
    while (t * 2 <= hw and hw % (t * 2) == 0
           and 2 * bytes_per_col * (t * 2) <= budget_bytes):
        t *= 2
    return t


def downsampler_block(x_nchw, w, b, gamma, beta, eps=_BN_EPS):
    """Forward pass of DownsamplerBlock. x_nchw: (N, Cin, H, W) float32."""
    N, Cin, H, W = x_nchw.shape
    assert H % 2 == 0 and W % 2 == 0, "stride-2 block expects even H, W"
    Cconv = w.shape[0]
    Cout = Cconv + Cin
    Ho, Wo = H // 2, W // 2
    HW = Ho * Wo
    P = N * HW

    bytes_per_col = (9 * Cin + 2 * Cout) * 4        # pass-1 in + out, f32
    tile_hw = _pick_tile_hw(HW, bytes_per_col)
    n_tiles = HW // tile_hw

    # ---- XLA glue: im2col in (N, 9*Cin, Ho*Wo) channels-on-sublanes layout -
    # TODO(synk): replace with an in-kernel tap gather (memory_space=pl.ANY +
    # manual strided DMA) to avoid writing/re-reading 2.25x the input in HBM.
    xp = jnp.pad(x_nchw, ((0, 0), (0, 0), (1, 1), (1, 1)))
    taps = [xp[:, :, ky:ky + 2 * Ho:2, kx:kx + 2 * Wo:2]       # (N, Cin, Ho, Wo)
            for ky in range(3) for kx in range(3)]
    patches = jnp.stack(taps, axis=1).reshape(N, 9 * Cin, HW)

    # conv weight (Cconv, Cin, 3, 3) -> (Cconv, ky, kx, Cin) -> (Cconv, 9*Cin)
    w2 = jnp.transpose(w, (0, 2, 3, 1)).reshape(Cconv, 9 * Cin)
    # b is intentionally unused: it cancels exactly under training-mode BN.

    # ---- pass 1: conv + pool + per-channel sum / sumsq ----------------------
    grid_a = pltpu.PrefetchScalarGridSpec(
        num_scalar_prefetch=0,
        grid=(N, n_tiles),
        in_specs=[
            pl.BlockSpec((1, 9 * Cin, tile_hw), lambda n, t: (n, 0, t)),
            pl.BlockSpec((Cconv, 9 * Cin), lambda n, t: (0, 0)),
        ],
        out_specs=[
            pl.BlockSpec((1, Cout, tile_hw), lambda n, t: (n, 0, t)),
            pl.BlockSpec((1, Cout, 1), lambda n, t: (n, 0, 0)),
            pl.BlockSpec((1, Cout, 1), lambda n, t: (n, 0, 0)),
        ],
    )
    y3d, sums_n, sqs_n = pl.pallas_call(
        _conv_pool_stats_kernel,
        out_shape=(jax.ShapeDtypeStruct((N, Cout, HW), jnp.float32),
                   jax.ShapeDtypeStruct((N, Cout, 1), jnp.float32),
                   jax.ShapeDtypeStruct((N, Cout, 1), jnp.float32)),
        grid_spec=grid_a,
        compiler_params=pltpu.CompilerParams(
            dimension_semantics=("parallel", "arbitrary"),
            vmem_limit_bytes=_VMEM_LIMIT_BYTES),
    )(patches, w2)

    # ---- tiny per-channel stat math (Cout x 1) in XLA -----------------------
    # TODO(synk): E[x^2]-E[x]^2 in f32 can lose precision for very large P;
    # switch to a Welford-style per-tile merge if that ever matters.
    sums = jnp.sum(sums_n, axis=0)                       # (Cout, 1)
    sqs = jnp.sum(sqs_n, axis=0)                         # (Cout, 1)
    mean = sums / P
    var = jnp.maximum(sqs / P - mean * mean, 0.0)
    inv = jax.lax.rsqrt(var + eps)
    scale = gamma.reshape(Cout, 1) * inv
    shift = beta.reshape(Cout, 1) - mean * scale

    # ---- pass 2: normalize + affine + ReLU, written straight in NCHW layout -
    grid_b = pltpu.PrefetchScalarGridSpec(
        num_scalar_prefetch=0,
        grid=(N, n_tiles),
        in_specs=[
            pl.BlockSpec((1, Cout, tile_hw), lambda n, t: (n, 0, t)),
            pl.BlockSpec((Cout, 1), lambda n, t: (0, 0)),
            pl.BlockSpec((Cout, 1), lambda n, t: (0, 0)),
        ],
        out_specs=pl.BlockSpec((1, Cout, tile_hw), lambda n, t: (n, 0, t)),
    )
    out3d = pl.pallas_call(
        _bn_relu_kernel,
        out_shape=jax.ShapeDtypeStruct((N, Cout, HW), jnp.float32),
        grid_spec=grid_b,
        input_output_aliases={0: 0},       # in-place: y3d is dead after pass 2
        compiler_params=pltpu.CompilerParams(
            dimension_semantics=("parallel", "parallel"),
            vmem_limit_bytes=_VMEM_LIMIT_BYTES),
    )(y3d, scale, shift)

    # (N, Cout, Ho*Wo) -> (N, Cout, Ho, Wo): pure reshape, no transpose.
    return out3d.reshape(N, Cout, Ho, Wo)


def reference_downsampler(x, w, b, gamma, beta, eps=_BN_EPS):
    """Pure-JAX reference replicating the PyTorch forward (training-mode BN)."""
    conv = jax.lax.conv_general_dilated(
        x, w, window_strides=(2, 2), padding=((1, 1), (1, 1)),
        dimension_numbers=("NCHW", "OIHW", "NCHW"))
    conv = conv + b[None, :, None, None]
    pool = jax.lax.reduce_window(x, -jnp.inf, jax.lax.max,
                                 (1, 1, 2, 2), (1, 1, 2, 2), "VALID")
    out = jnp.concatenate([conv, pool], axis=1)
    mean = jnp.mean(out, axis=(0, 2, 3), keepdims=True)
    var = jnp.mean((out - mean) ** 2, axis=(0, 2, 3), keepdims=True)
    out = (out - mean) / jnp.sqrt(var + eps)
    out = out * gamma[None, :, None, None] + beta[None, :, None, None]
    return jnp.maximum(out, 0.0)


if __name__ == "__main__":
    # DownsamplerBlock(ninput=4, noutput=8): conv has 8-4=4 output channels.
    N, Cin, H, W = 2, 4, 16, 16
    Cout = 8
    Cconv = Cout - Cin

    key = jax.random.PRNGKey(0)
    k1, k2, k3, k4, k5 = jax.random.split(key, 5)
    x = jax.random.normal(k1, (N, Cin, H, W), jnp.float32)
    w = 0.1 * jax.random.normal(k2, (Cconv, Cin, 3, 3), jnp.float32)
    b = 0.01 * jax.random.normal(k3, (Cconv,), jnp.float32)
    gamma = 1.0 + 0.1 * jax.random.normal(k4, (Cout,), jnp.float32)
    beta = 0.1 * jax.random.normal(k5, (Cout,), jnp.float32)

    fwd = jax.jit(downsampler_block)
    out = jax.block_until_ready(fwd(x, w, b, gamma, beta))

    ref = reference_downsampler(x, w, b, gamma, beta)
    assert out.shape == (N, Cout, H // 2, W // 2), out.shape
    assert jnp.allclose(out, ref, atol=1e-4, rtol=1e-4), \
        float(jnp.max(jnp.abs(out - ref)))
    print("KERNEL_OK")
</pallas_src>

<mosaic_0001>
module attributes {stable_mosaic.version = 11 : i64} {
  func.func @_conv_pool_stats_kernel(%arg0: i32, %arg1: i32, %arg2: memref<1x36x64xf32, #tpu.memory_space<vmem>>, %arg3: memref<4x36xf32, #tpu.memory_space<vmem>>, %arg4: memref<1x8x64xf32, #tpu.memory_space<vmem>>, %arg5: memref<1x8x1xf32, #tpu.memory_space<vmem>>, %arg6: memref<1x8x1xf32, #tpu.memory_space<vmem>>) attributes {dimension_semantics = [#tpu.dimension_semantics<parallel>, #tpu.dimension_semantics<arbitrary>], iteration_bounds = array<i64: 2, 1>, scalar_prefetch = 0 : i64, scratch_operands = 0 : i64, tpu.core_type = #tpu.core_type<tc>, window_params = [{transform_indices = @transform_0, window_bounds = array<i64: 1, 36, 64>}, {pipeline_mode = #tpu.pipeline_mode<synchronous>, transform_indices = @transform_1, window_bounds = array<i64: 4, 36>}, {transform_indices = @transform_2, window_bounds = array<i64: 1, 8, 64>}, {transform_indices = @transform_3, window_bounds = array<i64: 1, 8, 1>}, {transform_indices = @transform_4, window_bounds = array<i64: 1, 8, 1>}]} {
    %c0 = arith.constant 0 : index
    %c0_0 = arith.constant 0 : index
    %c0_1 = arith.constant 0 : index
    %0 = vector.load %arg2[%c0, %c0_0, %c0_1] : memref<1x36x64xf32, #tpu.memory_space<vmem>>, vector<1x36x64xf32>
    %1 = vector.shape_cast %0 : vector<1x36x64xf32> to vector<36x64xf32>
    %c0_2 = arith.constant 0 : index
    %c0_3 = arith.constant 0 : index
    %2 = vector.load %arg3[%c0_2, %c0_3] : memref<4x36xf32, #tpu.memory_space<vmem>>, vector<4x36xf32>
    %cst = arith.constant dense<0.000000e+00> : vector<4x64xf32>
    %3 = tpu.matmul %2, %1, %cst {dimension_numbers = #tpu.dot_dimension_numbers<[1], [0], [0], [1], [0, 0, 1, 1], [], []>} : vector<4x36xf32>, vector<36x64xf32>, vector<4x64xf32> -> vector<4x64xf32>
    %4 = vector.extract_strided_slice %1 {offsets = [16, 0], sizes = [4, 64], strides = [1, 1]} : vector<36x64xf32> to vector<4x64xf32>
    %5 = vector.extract_strided_slice %1 {offsets = [20, 0], sizes = [4, 64], strides = [1, 1]} : vector<36x64xf32> to vector<4x64xf32>
    %6 = arith.maximumf %4, %5 : vector<4x64xf32>
    %7 = vector.extract_strided_slice %1 {offsets = [28, 0], sizes = [4, 64], strides = [1, 1]} : vector<36x64xf32> to vector<4x64xf32>
    %8 = vector.extract_strided_slice %1 {offsets = [32, 0], sizes = [4, 64], strides = [1, 1]} : vector<36x64xf32> to vector<4x64xf32>
    %9 = arith.maximumf %7, %8 : vector<4x64xf32>
    %10 = arith.maximumf %6, %9 : vector<4x64xf32>
    %11 = tpu.concatenate %3, %10 in 0 : vector<4x64xf32>, vector<4x64xf32> -> vector<8x64xf32>
    %c0_4 = arith.constant 0 : index
    %c0_5 = arith.constant 0 : index
    %c0_6 = arith.constant 0 : index
    %12 = vector.load %arg4[%c0_4, %c0_5, %c0_6] : memref<1x8x64xf32, #tpu.memory_space<vmem>>, vector<1x8x64xf32>
    %13 = vector.shape_cast %12 : vector<1x8x64xf32> to vector<8x64xf32>
    %14 = vector.shape_cast %11 : vector<8x64xf32> to vector<1x8x64xf32>
    tpu.vector_store %arg4[%c0_4, %c0_5, %c0_6], %14 {strides = array<i32>} : memref<1x8x64xf32, #tpu.memory_space<vmem>>, vector<1x8x64xf32>,
    %c0_i32 = arith.constant 0 : i32
    %15 = arith.cmpi eq, %arg1, %c0_i32 : i32
    %16 = arith.extui %15 : i1 to i32
    %c0_i32_7 = arith.constant 0 : i32
    %17 = arith.cmpi ne, %16, %c0_i32_7 : i32
    scf.if %17 {
      %cst_22 = arith.constant 0.000000e+00 : f32
      %35 = vector.broadcast %cst_22 : f32 to vector<1x8x1xf32>
      %c0_23 = arith.constant 0 : index
      %c0_24 = arith.constant 0 : index
      %c0_25 = arith.constant 0 : index
      %36 = vector.load %arg5[%c0_23, %c0_24, %c0_25] : memref<1x8x1xf32, #tpu.memory_space<vmem>>, vector<1x8x1xf32>
      tpu.vector_store %arg5[%c0_23, %c0_24, %c0_25], %35 {strides = array<i32>} : memref<1x8x1xf32, #tpu.memory_space<vmem>>, vector<1x8x1xf32>,
      %cst_26 = arith.constant 0.000000e+00 : f32
      %37 = vector.broadcast %cst_26 : f32 to vector<1x8x1xf32>
      %c0_27 = arith.constant 0 : index
      %c0_28 = arith.constant 0 : index
      %c0_29 = arith.constant 0 : index
      %38 = vector.load %arg6[%c0_27, %c0_28, %c0_29] : memref<1x8x1xf32, #tpu.memory_space<vmem>>, vector<1x8x1xf32>
      tpu.vector_store %arg6[%c0_27, %c0_28, %c0_29], %37 {strides = array<i32>} : memref<1x8x1xf32, #tpu.memory_space<vmem>>, vector<1x8x1xf32>,
    } else {
    }
    %c0_8 = arith.constant 0 : index
    %c0_9 = arith.constant 0 : index
    %c0_10 = arith.constant 0 : index
    %18 = vector.load %arg5[%c0_8, %c0_9, %c0_10] : memref<1x8x1xf32, #tpu.memory_space<vmem>>, vector<1x8x1xf32>
    %19 = vector.shape_cast %18 : vector<1x8x1xf32> to vector<8x1xf32>
    %cst_11 = arith.constant dense<0.000000e+00> : vector<8xf32>
    %20 = vector.multi_reduction <add>, %11, %cst_11 [1] : vector<8x64xf32> to vector<8xf32>
    %21 = vector.shape_cast %20 : vector<8xf32> to vector<8x1xf32>
    %22 = arith.addf %19, %21 : vector<8x1xf32>
    %c0_12 = arith.constant 0 : index
    %c0_13 = arith.constant 0 : index
    %c0_14 = arith.constant 0 : index
    %23 = vector.load %arg5[%c0_12, %c0_13, %c0_14] : memref<1x8x1xf32, #tpu.memory_space<vmem>>, vector<1x8x1xf32>
    %24 = vector.shape_cast %23 : vector<1x8x1xf32> to vector<8x1xf32>
    %25 = vector.shape_cast %22 : vector<8x1xf32> to vector<1x8x1xf32>
    tpu.vector_store %arg5[%c0_12, %c0_13, %c0_14], %25 {strides = array<i32>} : memref<1x8x1xf32, #tpu.memory_space<vmem>>, vector<1x8x1xf32>,
    %c0_15 = arith.constant 0 : index
    %c0_16 = arith.constant 0 : index
    %c0_17 = arith.constant 0 : index
    %26 = vector.load %arg6[%c0_15, %c0_16, %c0_17] : memref<1x8x1xf32, #tpu.memory_space<vmem>>, vector<1x8x1xf32>
    %27 = vector.shape_cast %26 : vector<1x8x1xf32> to vector<8x1xf32>
    %28 = arith.mulf %11, %11 : vector<8x64xf32>
    %cst_18 = arith.constant dense<0.000000e+00> : vector<8xf32>
    %29 = vector.multi_reduction <add>, %28, %cst_18 [1] : vector<8x64xf32> to vector<8xf32>
    %30 = vector.shape_cast %29 : vector<8xf32> to vector<8x1xf32>
    %31 = arith.addf %27, %30 : vector<8x1xf32>
    %c0_19 = arith.constant 0 : index
    %c0_20 = arith.constant 0 : index
    %c0_21 = arith.constant 0 : index
    %32 = vector.load %arg6[%c0_19, %c0_20, %c0_21] : memref<1x8x1xf32, #tpu.memory_space<vmem>>, vector<1x8x1xf32>
    %33 = vector.shape_cast %32 : vector<1x8x1xf32> to vector<8x1xf32>
    %34 = vector.shape_cast %31 : vector<8x1xf32> to vector<1x8x1xf32>
    tpu.vector_store %arg6[%c0_19, %c0_20, %c0_21], %34 {strides = array<i32>} : memref<1x8x1xf32, #tpu.memory_space<vmem>>, vector<1x8x1xf32>,
    return
  }
  func.func @transform_0(%arg0: i32, %arg1: i32) -> (i32, i32, i32) {
    %c0_i32 = arith.constant 0 : i32
    %c0_i32_0 = arith.constant 0 : i32
    return %arg0, %c0_i32, %arg1 : i32, i32, i32
  }
  func.func @transform_1(%arg0: i32, %arg1: i32) -> (i32, i32) {
    %c0_i32 = arith.constant 0 : i32
    %c0_i32_0 = arith.constant 0 : i32
    %c0_i32_1 = arith.constant 0 : i32
    return %c0_i32, %c0_i32_0 : i32, i32
  }
  func.func @transform_2(%arg0: i32, %arg1: i32) -> (i32, i32, i32) {
    %c0_i32 = arith.constant 0 : i32
    %c0_i32_0 = arith.constant 0 : i32
    return %arg0, %c0_i32, %arg1 : i32, i32, i32
  }
  func.func @transform_3(%arg0: i32, %arg1: i32) -> (i32, i32, i32) {
    %c0_i32 = arith.constant 0 : i32
    %c0_i32_0 = arith.constant 0 : i32
    %c0_i32_1 = arith.constant 0 : i32
    return %arg0, %c0_i32, %c0_i32_0 : i32, i32, i32
  }
  func.func @transform_4(%arg0: i32, %arg1: i32) -> (i32, i32, i32) {
    %c0_i32 = arith.constant 0 : i32
    %c0_i32_0 = arith.constant 0 : i32
    %c0_i32_1 = arith.constant 0 : i32
    return %arg0, %c0_i32, %c0_i32_0 : i32, i32, i32
  }
}

module attributes {stable_mosaic.version = 11 : i64} {
  func.func @_bn_relu_kernel(%arg0: i32, %arg1: i32, %arg2: memref<1x8x64xf32, #tpu.memory_space<vmem>>, %arg3: memref<8x1xf32, #tpu.memory_space<vmem>>, %arg4: memref<8x1xf32, #tpu.memory_space<vmem>>, %arg5: memref<1x8x64xf32, #tpu.memory_space<vmem>>) attributes {dimension_semantics = [#tpu.dimension_semantics<parallel>, #tpu.dimension_semantics<parallel>], iteration_bounds = array<i64: 2, 1>, scalar_prefetch = 0 : i64, scratch_operands = 0 : i64, tpu.core_type = #tpu.core_type<tc>, window_params = [{transform_indices = @transform_0, window_bounds = array<i64: 1, 8, 64>}, {pipeline_mode = #tpu.pipeline_mode<synchronous>, transform_indices = @transform_1, window_bounds = array<i64: 8, 1>}, {pipeline_mode = #tpu.pipeline_mode<synchronous>, transform_indices = @transform_2, window_bounds = array<i64: 8, 1>}, {transform_indices = @transform_3, window_bounds = array<i64: 1, 8, 64>}]} {
    %c0 = arith.constant 0 : index
    %c0_0 = arith.constant 0 : index
    %c0_1 = arith.constant 0 : index
    %0 = vector.load %arg2[%c0, %c0_0, %c0_1] : memref<1x8x64xf32, #tpu.memory_space<vmem>>, vector<1x8x64xf32>
    %c0_2 = arith.constant 0 : index
    %c0_3 = arith.constant 0 : index
    %1 = vector.load %arg3[%c0_2, %c0_3] : memref<8x1xf32, #tpu.memory_space<vmem>>, vector<8x1xf32>
    %2 = vector.shape_cast %1 : vector<8x1xf32> to vector<1x8x1xf32>
    %3 = vector.broadcast %2 : vector<1x8x1xf32> to vector<1x8x64xf32>
    %4 = arith.mulf %0, %3 : vector<1x8x64xf32>
    %c0_4 = arith.constant 0 : index
    %c0_5 = arith.constant 0 : index
    %5 = vector.load %arg4[%c0_4, %c0_5] : memref<8x1xf32, #tpu.memory_space<vmem>>, vector<8x1xf32>
    %6 = vector.shape_cast %5 : vector<8x1xf32> to vector<1x8x1xf32>
    %7 = vector.broadcast %6 : vector<1x8x1xf32> to vector<1x8x64xf32>
    %8 = arith.addf %4, %7 : vector<1x8x64xf32>
    %cst = arith.constant 0.000000e+00 : f32
    %9 = vector.broadcast %cst : f32 to vector<1x8x64xf32>
    %10 = arith.maximumf %8, %9 : vector<1x8x64xf32>
    %c0_6 = arith.constant 0 : index
    %c0_7 = arith.constant 0 : index
    %c0_8 = arith.constant 0 : index
    %11 = vector.load %arg5[%c0_6, %c0_7, %c0_8] : memref<1x8x64xf32, #tpu.memory_space<vmem>>, vector<1x8x64xf32>
    tpu.vector_store %arg5[%c0_6, %c0_7, %c0_8], %10 {strides = array<i32>} : memref<1x8x64xf32, #tpu.memory_space<vmem>>, vector<1x8x64xf32>,
    return
  }
  func.func @transform_0(%arg0: i32, %arg1: i32) -> (i32, i32, i32) {
    %c0_i32 = arith.constant 0 : i32
    %c0_i32_0 = arith.constant 0 : i32
    return %arg0, %c0_i32, %arg1 : i32, i32, i32
  }
  func.func @transform_1(%arg0: i32, %arg1: i32) -> (i32, i32) {
    %c0_i32 = arith.constant 0 : i32
    %c0_i32_0 = arith.constant 0 : i32
    %c0_i32_1 = arith.constant 0 : i32
    return %c0_i32, %c0_i32_0 : i32, i32
  }
  func.func @transform_2(%arg0: i32, %arg1: i32) -> (i32, i32) {
    %c0_i32 = arith.constant 0 : i32
    %c0_i32_0 = arith.constant 0 : i32
    %c0_i32_1 = arith.constant 0 : i32
    return %c0_i32, %c0_i32_0 : i32, i32
  }
  func.func @transform_3(%arg0: i32, %arg1: i32) -> (i32, i32, i32) {
    %c0_i32 = arith.constant 0 : i32
    %c0_i32_0 = arith.constant 0 : i32
    return %arg0, %c0_i32, %arg1 : i32, i32, i32
  }
}

</mosaic_0001>

<bundles_post_ra>
// kernel: downsampler_block.2
= control target key start
LH: loop header
LB: loop body
LE: loop exit
PB: predicated region body
PF: predicated region fallthrough
CT: control target
= control target key end

     0   :  { %s627_s15 = smov 0   ;;  %s629_s16 = smov 0   ;;  %s675_s0 = inlined_call_operand.vmem [shape: f32[2,36,64], index: 0, kind: input, shape index: {}]   ;;  %s676_s1 = inlined_call_operand.vmem [shape: f32[4,36], index: 1, kind: input, shape index: {}]   ;;  %s677_s2 = inlined_call_operand.vmem [shape: f32[2,8,64], index: 2, kind: output, shape index: {0}]   ;;  %s678_s3 = inlined_call_operand.vmem [shape: f32[2,8,1], index: 3, kind: output, shape index: {1}]   ;;  %s679_s4 = inlined_call_operand.vmem [shape: f32[2,8,1], index: 4, kind: output, shape index: {2}]  }
   0x1   :  { %s631_s17 = smov 0  }
   0x2 LB: > { %s27_s18 = sadd.s32 1, %s593_s16  ;;  %p513_p0 = scmp.ge.s32.totalorder %s597_s17, 1  ;;  %s597_s17 = sphi %s631_s17, %s15_s17   ;;  %s593_s16 = sphi %s629_s16, %s681_s16   ;;  %s589_s15 = sphi %s627_s15, %s680_s15  }
   0x3   : > { %p29_p1 = scmp.ge.s32.totalorder %s27_s18, 2  ;;  %p186_p2 = scmp.lt.s32.totalorder %s597_s17, 3 }
   0x5   : > { %s683_s18 = smov (%p29_p1, %s27_s18), 0  ;;  %p187_p3 = pnand %p513_p0, %p186_p2 }
   0x6   : > { %p225_p4 = scmp.lt.s32.totalorder (!%p187_p3), %s589_s15, 1  ;;  %v599_v0 = vmov (!%p187_p3), 0.0|0.0   ;;  %vm600_vm0 = vmmov (!%p187_p3), 0   ;;  %v601_v1 = vmov (!%p187_p3), 0.0   ;;  %vm258_vm1 = vcmask (!%p187_p3), 1043456  }
   0x7   : > { %190 = sbr.rel (%p187_p3) target bundleno = 393 (0x189), region = 28  ;;  %541 = vmatprep.subr.bf16.mxu0 (!%p187_p3), %v599_v0  ;;  %538 = vmatprep.mubr.msk.f32.mxu0 (!%p187_p3), %vm600_vm0, %v601_v1  ;;  %v253_v11 = vld [vmem:[%s676_s1] sm:$0xf] (!%p187_p3)  ;;  %vm254_vm2 = vcmask (!%p187_p3), 293888   ;;  %vm353_vm3 = vcmask (!%p187_p3), 7168   ;;  %vm347_vm4 = vcmask (!%p187_p3), 523264  }
   0xe   : > { %s685_s15 = smov (!%p225_p4, %s589_s15), 1 }
   0xf   : > { %s547_s19 = smul.u32 40, %s685_s15  ;;  %s515_s25 = sshll.u32 %s685_s15, 3 }
  0x10   : > { %s243_s28 = scalar_lea.vmem %s678_s3, %s515_s25  ;;  %s239_s5 = scalar_lea.vmem %s677_s2, %s515_s25 }
  0x11   : > { %s232_s22 = scalar_lea.vmem %s675_s0, %s547_s19  ;;  %354 = vst.msk [vmem:[%s243_s28] sm:$0xff] %vm353_vm3, %v601_v1  ;;  %s247_s8 = scalar_lea.vmem %s679_s4, %s515_s25 }
  0x12   : > { %v248_v2 = vld [vmem:[%s232_s22] sm:$0xff]  ;;  %v249_v3 = vld [vmem:[%s232_s22 + $0x8] sm:$0xff]  ;;  %v250_v4 = vld [vmem:[%s232_s22 + $0x10] sm:$0xff]  ;;  %355 = vst.msk [vmem:[%s247_s8] sm:$0xff] %vm353_vm3, %v601_v1 }
  0x13   : > { %v542_v5 = vpack.c.bf16 %v249_v3, %v248_v2  ;;  %v251_v6 = vld [vmem:[%s232_s22 + $0x18] sm:$0xff]  ;;  %v252_v7 = vld [vmem:[%s232_s22 + $0x20] sm:$0xf]  ;;  %v333_v12 = vrot.slane %v250_v4, 4 }
  0x14   : > { %v336_v8 = vrot.slane %v252_v7, 4  ;;  %v545_v9 = vpack.c.bf16 %v251_v6, %v250_v4 }
  0x15   : > { %543 = vmatpush3.bf16.msra.mxu0 %v542_v5  ;;  %v335_v13 = vmax.f32 %v250_v4, %v333_v12 }
  0x16   : > { %544 = vmatprep.subr.bf16.mxu0 %v599_v0  ;;  %v338_v10 = vmax.f32 %v251_v6, %v336_v8 }
  0x18   : > { %v340_v14 = vrot.slane %v338_v10, 4  ;;  %v356_v23 = vld [vmem:[%s243_s28] sm:$0xff] }
  0x19   : > { %546 = vmatpush3.bf16.msra.mxu0 %v545_v9  ;;  %v363_v26 = vld [vmem:[%s247_s8] sm:$0xff] }
  0x1a   : > { %536 = vmatprep.subr.mxu0 %v601_v1  ;;  %v342_v15 = vmax.f32 %v335_v13, %v340_v14 }
  0x1c   : > { %v344_v16 = vrot.slane %v342_v15, 4 }
  0x1d   : > { %537 = vmatpush3.msk.msra.mxu0 %vm258_vm1, %v252_v7 }
  0x1e   : > { %539 = vmatmul.mubr.msk.f32.vlgmr.msra.gmra.mrb[0].mxu0 %vm254_vm2, %v253_v11 }
  0xf1   : > { %v328_v17 = vpop.f32.mrb[0].mxu0 }
  0xf2   : > { %v346_v18 = vsel %vm258_vm1, %v328_v17, %v344_v16  ;;  %v540_v19 = vpop.f32.mrb[1].mxu0 }
  0xf3   : > { %v357_v20 = vsel %vm347_vm4, %v346_v18, 0.0  ;;  %348 = vst.msk [vmem:[%s239_s5] sm:$0xff] %vm347_vm4, %v346_v18  ;;  %v364_v21 = vmul.f32 %v346_v18, %v346_v18 }
  0xf4   : > { %358 = vadd.xlane.f32.xlu0 %v357_v20 }
  0xf5   : > { %v365_v22 = vsel %vm347_vm4, %v364_v21, 0.0 }
  0xf8   : > { %366 = vadd.xlane.f32.xlu0 %v365_v22 }
 0x181   : > { %v359_v24 = vpop.xlane.xlu0 %358 }
 0x182   : > { %v360_v25 = vadd.f32 %v359_v24, %v356_v23 }
 0x184   : > { %362 = vst.msk [vmem:[%s243_s28] sm:$0xff] %vm353_vm3, %v360_v25 }
 0x185   : > { %v367_v27 = vpop.xlane.xlu0 %366 }
 0x186   : > { %v368_v28 = vadd.f32 %v367_v27, %v363_v26 }
 0x188   : > { %369 = vst.msk [vmem:[%s247_s8] sm:$0xff] %vm353_vm3, %v368_v28 }
 0x189 PF: > { %s15_s17 = sadd.s32 1, %s597_s17   ;;  %s680_s15 = smov %s593_s16 }
 0x18a   : > { %p12_p5 = scmp.ge.s32.totalorder %s15_s17, 4   ;;  %s681_s16 = smov %s683_s18 }
 0x18c   :  { %14 = sbr.rel (!%p12_p5) target bundleno = 2 (0x2), region = 86 }

// kernel: downsampler_block.3
= control target key start
LH: loop header
LB: loop body
LE: loop exit
PB: predicated region body
PF: predicated region fallthrough
CT: control target
= control target key end

     0   :  { %s369_s12 = smov 0   ;;  %s371_s13 = smov 0   ;;  %s405_s0 = inlined_call_operand.vmem [shape: f32[2,8,64], index: 0, kind: input, shape index: {}, may-alias: {0,3}]   ;;  %s406_s1 = inlined_call_operand.vmem [shape: f32[8,1], index: 1, kind: input, shape index: {}]   ;;  %s407_s2 = inlined_call_operand.vmem [shape: f32[8,1], index: 2, kind: input, shape index: {}]   ;;  %s408_s3 = inlined_call_operand.vmem [shape: f32[2,8,64], index: 3, kind: output, shape index: {}, may-alias: {0,3}]  }
   0x1   :  { %s373_s14 = smov 0  }
   0x2 LB: > { %s25_s15 = sadd.s32 1, %s342_s13  ;;  %p293_p0 = scmp.ge.s32.totalorder %s346_s14, 1  ;;  %s346_s14 = sphi %s373_s14, %s13_s14   ;;  %s342_s13 = sphi %s371_s13, %s410_s13   ;;  %s338_s12 = sphi %s369_s12, %s409_s12  }
   0x3   : > { %p27_p1 = scmp.ge.s32.totalorder %s25_s15, 2  ;;  %p155_p2 = scmp.lt.s32.totalorder %s346_s14, 3 }
   0x5   : > { %s412_s15 = smov (%p27_p1, %s25_s15), 0  ;;  %p156_p3 = pnand %p293_p0, %p155_p2 }
   0x6   : > { %v198_v0 = vld [vmem:[%s406_s1] sm:$0xff] (!%p156_p3)  ;;  %v348_v1 = vmov (!%p156_p3), 0   ;;  %p183_p4 = scmp.lt.s32.totalorder (!%p156_p3), %s338_s12, 1  ;;  %vm213_vm0 = vcmask (!%p156_p3), 523264  }
   0x7   : > { %159 = sbr.rel (%p156_p3) target bundleno = 145 (0x91), region = 32  ;;  %323 = vset.pattern.permute.xlu0 (!%p156_p3), %v348_v1  ;;  %v205_v2 = vld [vmem:[%s407_s2] sm:$0xff] (!%p156_p3) }
   0x8   : > { %201 = vperm.xlu0 (!%p156_p3), %323, %v198_v0  }
   0xc   : > { %208 = vperm.xlu0 (!%p156_p3), %323, %v205_v2  }
   0xe   : > { %s414_s12 = smov (!%p183_p4, %s338_s12), 1 }
   0xf   : > { %s294_s20 = sshll.u32 %s414_s12, 3 }
  0x10   : > { %s189_s23 = scalar_lea.vmem %s405_s0, %s294_s20  ;;  %s196_s26 = scalar_lea.vmem %s408_s3, %s294_s20 }
  0x11   : > { %v197_v4 = vld [vmem:[%s189_s23] sm:$0xff] }
  0x87   : > { %v202_v3 = vpop.permute.xlu0 %201 }
  0x88   : > { %v204_v5 = vmul.f32 %v202_v3, %v197_v4 }
  0x8b   : > { %v209_v6 = vpop.permute.xlu0 %208 }
  0x8c   : > { %v211_v7 = vadd.f32 %v209_v6, %v204_v5 }
  0x8e   : > { %v212_v8 = vmax.f32 %v211_v7, 0.0 }
  0x90   : > { %214 = vst.msk [vmem:[%s196_s26] sm:$0xff] %vm213_vm0, %v212_v8 }
  0x91 PF: > { %s13_s14 = sadd.s32 1, %s346_s14   ;;  %s409_s12 = smov %s342_s13 }
  0x92   : > { %p10_p5 = scmp.ge.s32.totalorder %s13_s14, 4   ;;  %s410_s13 = smov %s412_s15 }
  0x94   :  { %12 = sbr.rel (!%p10_p5) target bundleno = 2 (0x2), region = 62 }

</bundles_post_ra>
